<compile_context>
chip_gen: v5e
topology: v5e:2x2
jax: 0.10.0
libtpu: 0.0.40
codegen_flags: <defaults>
</compile_context>

<pallas_src>
import functools

import numpy as np
import jax
import jax.numpy as jnp
from jax import lax
from jax.experimental import pallas as pl
from jax.experimental.pallas import tpu as pltpu

_VMEM_LIMIT_BYTES = 32 * 1024 * 1024        # requested scoped VMEM (safe on v5e/v6e/v7x)
_MASK_VALUE = float(-np.finfo(np.float32).max)


# ----------------------------------------------------------------------------- #
# Plain-JAX glue (mirrors the torch helpers exactly)
# ----------------------------------------------------------------------------- #
def sinusoidal_embeddings(n, dim):
    inv_freq = 1.0 / (10000.0 ** (jnp.arange(0, dim, 2, dtype=jnp.float32) / dim))
    t = jnp.arange(n, dtype=jnp.float32)
    freqs = jnp.einsum("i,j->ij", t, inv_freq)
    return jnp.concatenate([freqs, freqs], axis=-1)  # (n, dim)


def rotate_half(x):
    x1, x2 = jnp.split(x, 2, axis=-1)
    return jnp.concatenate([-x2, x1], axis=-1)


def apply_rotary_pos_emb(q, k, freqs):
    cos, sin = jnp.cos(freqs), jnp.sin(freqs)
    q = q * cos + rotate_half(q) * sin
    k = k * cos + rotate_half(k) * sin
    return q, k


def look_around_jax(x, backward=1, forward=0, pad_value=-1, dim=2):
    # Used only by the pure-JAX reference below.
    t = x.shape[1]
    pad_width = [(0, 0)] * x.ndim
    pad_width[1] = (backward, forward)
    padded = jnp.pad(x, pad_width, constant_values=pad_value)
    tensors = [padded[:, ind:ind + t] for ind in range(forward + backward + 1)]
    return jnp.concatenate(tensors, axis=dim)


# ----------------------------------------------------------------------------- #
# Pallas kernel: one (batch*head, window-block) tile per grid step.
#   q block    : (M, D)        M = WB * W consecutive query rows
#   k/v block  : (N_kv, D)     N_kv = (WB + LB + LF) * W neighbouring keys
#   keep block : (M, N_kv)     host-precomputed {0,1}: in-band AND not causal-masked
#   fill block : (M, N_kv)     host-precomputed {mask_value (in-band), -inf (out-of-band)}
#   col block  : (1, N_kv)     optional runtime column validity (pad / bin mask)
# ----------------------------------------------------------------------------- #
def _local_attn_kernel(*refs, scale, has_col):
    if has_col:
        q_ref, k_ref, v_ref, keep_ref, fill_ref, col_ref, o_ref = refs
    else:
        q_ref, k_ref, v_ref, keep_ref, fill_ref, o_ref = refs
        col_ref = None

    # Scale q (M*D elements) instead of sim (M*N_kv elements).
    q = q_ref[0, 0] * scale                     # (M, D)
    k = k_ref[0, 0]                             # (N_kv, D)
    v = v_ref[0, 0]                             # (N_kv, D)

    # QK^T on the MXU; bf16 inputs accumulate in f32.
    sim = lax.dot_general(q, k, (((1,), (1,)), ((), ())),
                          preferred_element_type=jnp.float32)   # (M, N_kv) f32

    # Single fused masking pass:
    #   keep & col_ok -> keep sim
    #   else          -> fill (mask_value for in-band masked cols, -inf out-of-band)
    ok = keep_ref[0] > 0.5                      # (M, N_kv) bool, host constant
    if has_col:
        ok = jnp.logical_and(ok, col_ref[0, 0] > 0.5)   # broadcast (1, N_kv)
    sim = jnp.where(ok, sim, fill_ref[0])

    # Softmax (unnormalized) + PV matmul, normalize on the (M, D) output.
    m = jnp.max(sim, axis=-1, keepdims=True)
    p = jnp.exp(sim - m)                        # out-of-band -> exp(-inf) = 0 exactly
    denom = jnp.sum(p, axis=-1, keepdims=True)  # >= 1 always (diagonal window in-band)

    if v.dtype != jnp.float32:
        p = p.astype(v.dtype)                   # bf16 MXU feed, f32 accumulation
    out = lax.dot_general(p, v, (((1,), (0,)), ((), ())),
                          preferred_element_type=jnp.float32)   # (M, D)
    out = out * (1.0 / denom)                   # scale (M, D), not (M, N_kv)

    o_ref[0, 0] = out.astype(o_ref.dtype)


# ----------------------------------------------------------------------------- #
# Tile-size selection: windows per grid step; waste-, lane- and VMEM-aware.
# ----------------------------------------------------------------------------- #
def _choose_windows_per_block(windows, W, D, LB, LF, itemsize, vmem_budget_bytes):
    # Cost per query row (arbitrary units):
    #   * ~5 elementwise/reduce passes over the lane-padded slab width
    #   * amortized per-grid-step overhead (~0.35 us) spread over the M rows
    SLAB_PASSES = 5.0
    STEP_OVERHEAD = 8.0e4
    best_wb, best_cost = 1, None
    for wb in range(1, windows + 1):
        if windows % wb:
            continue
        m = wb * W
        nkv = (wb + LB + LF) * W
        step_bytes = (2 * (2 * m * D + 2 * nkv * D) * itemsize   # dbl-buffered q/out/k/v
                      + 4 * m * nkv * 4                          # keep + fill constants
                      + 3 * m * nkv * 4)                         # f32 sim/probs temps
        if step_bytes > vmem_budget_bytes:
            continue
        nkv_lanes = -(-nkv // 128) * 128
        cost = SLAB_PASSES * nkv_lanes + STEP_OVERHEAD / m
        if m < 64:
            cost *= 1.15       # too few rows: poor MXU fill / masked sublanes
        if nkv % 128:
            cost *= 1.05       # prefer lane-dense N_kv
        if best_cost is None or cost < best_cost:
            best_wb, best_cost = wb, cost
    return best_wb


# ----------------------------------------------------------------------------- #
# Wrapper = torch LocalAttention.forward
# ----------------------------------------------------------------------------- #
def local_attention(q, k, v, *, window_size, causal=False, look_backward=1,
                    look_forward=None, autopad=False, exact_windowsize=False,
                    pad_value=-1, rel_pos_emb_dim=None, bin_attention_mask=None):
    # NOTE: nn.Dropout with p=0.0 / eval mode is the identity, so it is omitted.
    look_forward = (0 if causal else 1) if look_forward is None else look_forward
    assert not (causal and look_forward > 0)

    lead_shape = q.shape[:-2]
    n_in, d_in = q.shape[-2], q.shape[-1]
    q = q.reshape(-1, n_in, d_in)
    k = k.reshape(-1, n_in, d_in)
    v = v.reshape(-1, n_in, d_in)

    if rel_pos_emb_dim is not None:
        freqs = sinusoidal_embeddings(n_in, rel_pos_emb_dim)
        q, k = apply_rotary_pos_emb(q, k, freqs)

    needed_pad = False
    orig_seq_len = q.shape[1]
    if autopad:
        rem = (-orig_seq_len) % window_size
        needed_pad = rem > 0
        if needed_pad:
            pw = [(0, 0), (0, rem), (0, 0)]
            q, k, v = (jnp.pad(t, pw) for t in (q, k, v))

    B, n, dim_head = q.shape
    assert n % window_size == 0, "sequence length must be divisible by window size"
    W = window_size
    LB, LF = look_backward, look_forward
    windows = n // W
    scale = dim_head ** (-0.5)

    WB = _choose_windows_per_block(windows, W, dim_head, LB, LF, q.dtype.itemsize,
                                   (3 * _VMEM_LIMIT_BYTES) // 4)
    nblk = windows // WB
    M = WB * W                         # query rows per grid step
    KW = WB + LB + LF                  # K/V windows per grid step
    N_kv = KW * W

    # ---- blocked q, and K/V slabs (single pad, ~KW/WB HBM duplication) ------- #
    bq = q.reshape(B, nblk, M, dim_head)
    win_idx = np.arange(nblk)[:, None] * WB + np.arange(KW)[None, :]   # (nblk, KW)
    win_idx_j = jnp.asarray(win_idx, dtype=jnp.int32)

    def block_kv(t):
        tw = t.reshape(B, windows, W, dim_head)
        # pad with the literal pad_value, exactly like torch's look_around fill
        tp = jnp.pad(tw, [(0, 0), (LB, LF), (0, 0), (0, 0)],
                     constant_values=pad_value)
        return jnp.take(tp, win_idx_j, axis=1).reshape(B, nblk, N_kv, dim_head)

    bk = block_kv(k)
    bv = block_kv(v)

    # ---- host-precomputed relative masks (keep / fill) ----------------------- #
    ii = np.arange(M)[:, None]                 # query row inside block
    jj = np.arange(N_kv)[None, :]              # key column inside slab
    iw = ii // W                               # query window inside block
    jw = jj // W                               # key window inside slab
    in_band = (jw >= iw) & (jw <= iw + LB + LF)                 # (M, N_kv)
    k_rel = (jw - LB) * W + (jj % W)           # k_pos - blk*M (block-independent)
    fill_np = np.where(in_band, _MASK_VALUE, -np.inf).astype(np.float32)

    def keep_variant(blk):
        """keep = in-band AND not causal/exact-masked.  blk=None -> interior block
        (no out-of-range key windows); otherwise absolute positions + pad_value
        sentinel are used so look_around fill keys behave exactly like the ref."""
        if causal:
            if blk is None:
                bq_t, bq_k = ii, k_rel
            else:
                kwin = blk * WB + jw - LB
                fake = (kwin < 0) | (kwin >= windows)
                bq_t = blk * M + ii
                bq_k = np.where(fake, pad_value, blk * M + k_rel)
            cm = bq_t < bq_k
            if exact_windowsize:
                cm = cm | (bq_t > bq_k + W * LB)
        else:
            cm = np.zeros((M, N_kv), dtype=bool)
        return (in_band & ~cm).astype(np.float32)

    # Boundary blocks (containing pad_value fill windows) need their own variant
    # only when the exact-window causal mask compares against bq_k == pad_value.
    if causal and exact_windowsize and LB > 0:
        n_bound = min(nblk, -(-LB // WB))
    else:
        n_bound = 0
    n_var = n_bound + 1
    keep_arr = jnp.asarray(np.stack([keep_variant(b) for b in range(n_bound)]
                                    + [keep_variant(None)]))        # (n_var, M, N_kv)
    fill_arr = jnp.asarray(fill_np[None])                           # (1, M, N_kv)

    if n_var == 1:
        keep_map = lambda b, w: (0, 0, 0)
    else:
        keep_map = lambda b, w, _nv=n_var: (jnp.minimum(w, _nv - 1), 0, 0)

    # ---- runtime column validity (pad keys + bin attention mask), fused ------ #
    has_mask = bin_attention_mask is not None
    need_pad_mask = autopad and needed_pad          # matches the reference gating
    has_col = has_mask or need_pad_mask

    inputs = [bq, bk, bv, keep_arr, fill_arr]
    in_specs = [
        pl.BlockSpec((1, 1, M, dim_head), lambda b, w: (b, w, 0, 0)),
        pl.BlockSpec((1, 1, N_kv, dim_head), lambda b, w: (b, w, 0, 0)),
        pl.BlockSpec((1, 1, N_kv, dim_head), lambda b, w: (b, w, 0, 0)),
        pl.BlockSpec((1, M, N_kv), keep_map),
        pl.BlockSpec((1, M, N_kv), lambda b, w: (0, 0, 0)),
    ]

    if has_col:
        kwin = win_idx - LB                                         # (nblk, KW)
        col_ok_w = np.ones((nblk, KW), dtype=bool)
        if need_pad_mask:
            col_ok_w = (kwin >= 0) & (kwin < windows)
        col_ok_w = np.repeat(col_ok_w, W, axis=1)                   # (nblk, N_kv)

        if has_mask:
            mask = bin_attention_mask.astype(bool)
            batch = mask.shape[0]
            assert B % batch == 0
            h_rep = B // batch
            if autopad and needed_pad:
                mask = jnp.pad(mask, [(0, 0), (0, n - mask.shape[1])],
                               constant_values=False)
            maskw = mask.reshape(batch, windows, W)
            maskp = jnp.pad(maskw, [(0, 0), (LB, LF), (0, 0)], constant_values=False)
            bmask = jnp.take(maskp, win_idx_j, axis=1).reshape(batch, nblk, N_kv)
            col_ok = jnp.logical_and(bmask, jnp.asarray(col_ok_w)[None])
        else:
            batch, h_rep = 1, B
            col_ok = jnp.asarray(col_ok_w)[None]                    # (1, nblk, N_kv)

        col_ok = col_ok.astype(jnp.float32).reshape(batch, nblk, 1, N_kv)
        inputs.append(col_ok)
        in_specs.append(
            pl.BlockSpec((1, 1, 1, N_kv), lambda b, w, _h=h_rep: (b // _h, w, 0, 0)))

    kernel = functools.partial(_local_attn_kernel, scale=scale, has_col=has_col)

    out = pl.pallas_call(
        kernel,
        out_shape=jax.ShapeDtypeStruct((B, nblk, M, dim_head), q.dtype),
        grid=(B, nblk),
        in_specs=in_specs,
        out_specs=pl.BlockSpec((1, 1, M, dim_head), lambda b, w: (b, w, 0, 0)),
        compiler_params=pltpu.CompilerParams(
            dimension_semantics=("parallel", "parallel"),
            vmem_limit_bytes=_VMEM_LIMIT_BYTES),
    )(*inputs)

    out = out.reshape(B, n, dim_head)
    if autopad and needed_pad:
        out = out[:, :orig_seq_len, :]
    return out.reshape(lead_shape + out.shape[-2:])


# ----------------------------------------------------------------------------- #
# Pure-JAX reference (direct transcription of the torch forward) for checking
# ----------------------------------------------------------------------------- #
def reference_local_attention(q, k, v, *, window_size, causal=False,
                              look_backward=1, look_forward=None, autopad=False,
                              exact_windowsize=False, pad_value=-1,
                              rel_pos_emb_dim=None, bin_attention_mask=None):
    look_forward = (0 if causal else 1) if look_forward is None else look_forward
    lead_shape = q.shape[:-2]
    n0, d0 = q.shape[-2], q.shape[-1]
    q, k, v = (t.reshape(-1, n0, d0) for t in (q, k, v))
    if rel_pos_emb_dim is not None:
        freqs = sinusoidal_embeddings(n0, rel_pos_emb_dim)
        q, k = apply_rotary_pos_emb(q, k, freqs)
    needed_pad = False
    orig = q.shape[1]
    if autopad:
        rem = (-orig) % window_size
        needed_pad = rem > 0
        if needed_pad:
            pw = [(0, 0), (0, rem), (0, 0)]
            q, k, v = (jnp.pad(t, pw) for t in (q, k, v))
    b, n, dim_head = q.shape
    scale = dim_head ** (-0.5)
    windows = n // window_size
    b_t = jnp.arange(n).reshape(1, windows, window_size)
    bq = q.reshape(b, windows, window_size, dim_head)
    bk = look_around_jax(k.reshape(b, windows, window_size, dim_head),
                         look_backward, look_forward, pad_value)
    bv = look_around_jax(v.reshape(b, windows, window_size, dim_head),
                         look_backward, look_forward, pad_value)
    bq_t = b_t[..., :, None]
    bq_k = look_around_jax(b_t, look_backward, look_forward, pad_value)[..., None, :]
    sim = jnp.einsum("bhie,bhje->bhij", bq, bk) * scale
    mask_value = -jnp.finfo(jnp.float32).max
    if causal:
        cm = bq_t < bq_k
        if exact_windowsize:
            cm = cm | (bq_t > bq_k + window_size * look_backward)
        sim = jnp.where(cm, mask_value, sim)
    if autopad and needed_pad:
        sim = jnp.where(bq_k == pad_value, mask_value, sim)
    if bin_attention_mask is not None:
        mask = bin_attention_mask.astype(bool)
        batch = mask.shape[0]
        h = b // batch
        if autopad and needed_pad:
            mask = jnp.pad(mask, [(0, 0), (0, n - mask.shape[1])],
                           constant_values=False)
        mask = mask.reshape(batch, windows, window_size)
        mask = look_around_jax(mask, look_backward, look_forward, False)
        mask = jnp.repeat(mask[:, :, None, :], h, axis=0)
        sim = jnp.where(~mask, mask_value, sim)
    attn = jax.nn.softmax(sim.astype(jnp.float32), axis=-1)
    out = jnp.einsum("bhij,bhje->bhie", attn, bv.astype(jnp.float32))
    out = out.reshape(b, n, dim_head)
    if autopad and needed_pad:
        out = out[:, :orig, :]
    return out.reshape(lead_shape + out.shape[-2:])


# ----------------------------------------------------------------------------- #
if __name__ == "__main__":
    key = jax.random.PRNGKey(0)
    B, H, N, D = 2, 2, 128, 64
    W = 16
    kq, kk, kv = jax.random.split(key, 3)
    q = jax.random.normal(kq, (B, H, N, D), jnp.float32)
    k = jax.random.normal(kk, (B, H, N, D), jnp.float32)
    v = jax.random.normal(kv, (B, H, N, D), jnp.float32)

    TOL = dict(atol=2e-3, rtol=2e-3)

    # 1) non-causal local attention with sinusoidal rotary pos-emb (look_forward=1)
    cfg1 = dict(window_size=W, causal=False, look_backward=1, rel_pos_emb_dim=D)
    out1 = jax.block_until_ready(local_attention(q, k, v, **cfg1))
    ref1 = reference_local_attention(q, k, v, **cfg1)
    assert out1.shape == (B, H, N, D)
    assert jnp.allclose(out1, ref1, **TOL), "non-causal mismatch"

    # 2) causal, exact window, with a binary attention mask (per-batch key padding)
    lengths = jnp.array([N, N - 37])
    bin_mask = (jnp.arange(N)[None, :] < lengths[:, None]).astype(jnp.float32)
    cfg2 = dict(window_size=W, causal=True, look_backward=1,
                exact_windowsize=True, bin_attention_mask=bin_mask)
    out2 = jax.block_until_ready(local_attention(q, k, v, **cfg2))
    ref2 = reference_local_attention(q, k, v, **cfg2)
    assert jnp.allclose(out2, ref2, **TOL), "causal mismatch"

    # 2b) causal + exact window WITHOUT a bin mask: exercises the boundary-block
    #     keep-variant (exact-window semantics on look_around pad_value keys).
    cfg2b = dict(window_size=W, causal=True, look_backward=1, exact_windowsize=True)
    out2b = jax.block_until_ready(local_attention(q, k, v, **cfg2b))
    ref2b = reference_local_attention(q, k, v, **cfg2b)
    assert jnp.allclose(out2b, ref2b, **TOL), "causal/exact boundary mismatch"

    # 3) autopad path (sequence length not a multiple of the window size)
    Np = 120
    qp, kp2, vp = q[:, :, :Np], k[:, :, :Np], v[:, :, :Np]
    cfg3 = dict(window_size=W, causal=True, look_backward=1, autopad=True,
                exact_windowsize=True, bin_attention_mask=bin_mask[:, :Np])
    out3 = jax.block_until_ready(local_attention(qp, kp2, vp, **cfg3))
    ref3 = reference_local_attention(qp, kp2, vp, **cfg3)
    assert out3.shape == (B, H, Np, D)
    assert jnp.allclose(out3, ref3, **TOL), "autopad mismatch"

    # 4) bf16 inputs (bf16 MXU feeds with f32 accumulation)
    qb, kb, vb = (t.astype(jnp.bfloat16) for t in (q, k, v))
    out4 = jax.block_until_ready(local_attention(qb, kb, vb, **cfg2))
    ref4 = reference_local_attention(qb.astype(jnp.float32),
                                     kb.astype(jnp.float32),
                                     vb.astype(jnp.float32), **cfg2)
    assert out4.dtype == jnp.bfloat16
    assert float(jnp.max(jnp.abs(out4.astype(jnp.float32) - ref4))) < 0.25, "bf16 mismatch"

    print("KERNEL_OK")
</pallas_src>

<mosaic_0001>
module attributes {stable_mosaic.version = 11 : i64} {
  func.func @_local_attn_kernel(%arg0: i32, %arg1: i32, %arg2: memref<1x1x64x64xf32, #tpu.memory_space<vmem>>, %arg3: memref<1x1x96x64xf32, #tpu.memory_space<vmem>>, %arg4: memref<1x1x96x64xf32, #tpu.memory_space<vmem>>, %arg5: memref<1x64x96xf32, #tpu.memory_space<vmem>>, %arg6: memref<1x64x96xf32, #tpu.memory_space<vmem>>, %arg7: memref<1x1x64x64xf32, #tpu.memory_space<vmem>>) attributes {dimension_semantics = [#tpu.dimension_semantics<parallel>, #tpu.dimension_semantics<parallel>], iteration_bounds = array<i64: 4, 2>, scalar_prefetch = 0 : i64, scratch_operands = 0 : i64, tpu.core_type = #tpu.core_type<tc>, window_params = [{transform_indices = @transform_0, window_bounds = array<i64: 1, 1, 64, 64>}, {transform_indices = @transform_1, window_bounds = array<i64: 1, 1, 96, 64>}, {transform_indices = @transform_2, window_bounds = array<i64: 1, 1, 96, 64>}, {pipeline_mode = #tpu.pipeline_mode<synchronous>, transform_indices = @transform_3, window_bounds = array<i64: 1, 64, 96>}, {pipeline_mode = #tpu.pipeline_mode<synchronous>, transform_indices = @transform_4, window_bounds = array<i64: 1, 64, 96>}, {transform_indices = @transform_5, window_bounds = array<i64: 1, 1, 64, 64>}]} {
    %c0 = arith.constant 0 : index
    %c0_0 = arith.constant 0 : index
    %c0_1 = arith.constant 0 : index
    %c0_2 = arith.constant 0 : index
    %0 = vector.load %arg2[%c0, %c0_0, %c0_1, %c0_2] : memref<1x1x64x64xf32, #tpu.memory_space<vmem>>, vector<1x1x64x64xf32>
    %1 = vector.shape_cast %0 : vector<1x1x64x64xf32> to vector<64x64xf32>
    %cst = arith.constant 1.250000e-01 : f32
    %2 = vector.broadcast %cst : f32 to vector<64x64xf32>
    %3 = arith.mulf %1, %2 : vector<64x64xf32>
    %c0_3 = arith.constant 0 : index
    %c0_4 = arith.constant 0 : index
    %c0_5 = arith.constant 0 : index
    %c0_6 = arith.constant 0 : index
    %4 = vector.load %arg3[%c0_3, %c0_4, %c0_5, %c0_6] : memref<1x1x96x64xf32, #tpu.memory_space<vmem>>, vector<1x1x96x64xf32>
    %5 = vector.shape_cast %4 : vector<1x1x96x64xf32> to vector<96x64xf32>
    %c0_7 = arith.constant 0 : index
    %c0_8 = arith.constant 0 : index
    %c0_9 = arith.constant 0 : index
    %c0_10 = arith.constant 0 : index
    %6 = vector.load %arg4[%c0_7, %c0_8, %c0_9, %c0_10] : memref<1x1x96x64xf32, #tpu.memory_space<vmem>>, vector<1x1x96x64xf32>
    %7 = vector.shape_cast %6 : vector<1x1x96x64xf32> to vector<96x64xf32>
    %cst_11 = arith.constant dense<0.000000e+00> : vector<64x96xf32>
    %8 = tpu.matmul %3, %5, %cst_11 {dimension_numbers = #tpu.dot_dimension_numbers<[1], [1], [0], [0], [0, 0, 1, 0], [], []>} : vector<64x64xf32>, vector<96x64xf32>, vector<64x96xf32> -> vector<64x96xf32>
    %c0_12 = arith.constant 0 : index
    %c0_13 = arith.constant 0 : index
    %c0_14 = arith.constant 0 : index
    %9 = vector.load %arg5[%c0_12, %c0_13, %c0_14] : memref<1x64x96xf32, #tpu.memory_space<vmem>>, vector<1x64x96xf32>
    %10 = vector.shape_cast %9 : vector<1x64x96xf32> to vector<64x96xf32>
    %cst_15 = arith.constant 5.000000e-01 : f32
    %11 = vector.broadcast %cst_15 : f32 to vector<64x96xf32>
    %12 = arith.cmpf ogt, %10, %11 : vector<64x96xf32>
    %c0_16 = arith.constant 0 : index
    %c0_17 = arith.constant 0 : index
    %c0_18 = arith.constant 0 : index
    %13 = vector.load %arg6[%c0_16, %c0_17, %c0_18] : memref<1x64x96xf32, #tpu.memory_space<vmem>>, vector<1x64x96xf32>
    %14 = vector.shape_cast %13 : vector<1x64x96xf32> to vector<64x96xf32>
    %15 = arith.select %12, %8, %14 : vector<64x96xi1>, vector<64x96xf32>
    %cst_19 = arith.constant dense<0xFF800000> : vector<64xf32>
    %16 = vector.multi_reduction <maximumf>, %15, %cst_19 [1] : vector<64x96xf32> to vector<64xf32>
    %17 = vector.shape_cast %16 : vector<64xf32> to vector<64x1xf32>
    %18 = vector.broadcast %17 : vector<64x1xf32> to vector<64x96xf32>
    %19 = arith.subf %15, %18 : vector<64x96xf32>
    %20 = math.exp %19 : vector<64x96xf32>
    %cst_20 = arith.constant dense<0.000000e+00> : vector<64xf32>
    %21 = vector.multi_reduction <add>, %20, %cst_20 [1] : vector<64x96xf32> to vector<64xf32>
    %22 = vector.shape_cast %21 : vector<64xf32> to vector<64x1xf32>
    %cst_21 = arith.constant dense<0.000000e+00> : vector<64x64xf32>
    %23 = tpu.matmul %20, %7, %cst_21 {dimension_numbers = #tpu.dot_dimension_numbers<[1], [0], [0], [1], [0, 0, 1, 1], [], []>} : vector<64x96xf32>, vector<96x64xf32>, vector<64x64xf32> -> vector<64x64xf32>
    %cst_22 = arith.constant 1.000000e+00 : f32
    %24 = vector.broadcast %cst_22 : f32 to vector<64x1xf32>
    %25 = arith.divf %24, %22 : vector<64x1xf32>
    %26 = vector.broadcast %25 : vector<64x1xf32> to vector<64x64xf32>
    %27 = arith.mulf %23, %26 : vector<64x64xf32>
    %c0_23 = arith.constant 0 : index
    %c0_24 = arith.constant 0 : index
    %c0_25 = arith.constant 0 : index
    %c0_26 = arith.constant 0 : index
    %28 = vector.load %arg7[%c0_23, %c0_24, %c0_25, %c0_26] : memref<1x1x64x64xf32, #tpu.memory_space<vmem>>, vector<1x1x64x64xf32>
    %29 = vector.shape_cast %28 : vector<1x1x64x64xf32> to vector<64x64xf32>
    %30 = vector.shape_cast %27 : vector<64x64xf32> to vector<1x1x64x64xf32>
    tpu.vector_store %arg7[%c0_23, %c0_24, %c0_25, %c0_26], %30 {strides = array<i32>} : memref<1x1x64x64xf32, #tpu.memory_space<vmem>>, vector<1x1x64x64xf32>,
    return
  }
  func.func @transform_0(%arg0: i32, %arg1: i32) -> (i32, i32, i32, i32) {
    %c0_i32 = arith.constant 0 : i32
    %c0_i32_0 = arith.constant 0 : i32
    %c0_i32_1 = arith.constant 0 : i32
    return %arg0, %arg1, %c0_i32, %c0_i32_0 : i32, i32, i32, i32
  }
  func.func @transform_1(%arg0: i32, %arg1: i32) -> (i32, i32, i32, i32) {
    %c0_i32 = arith.constant 0 : i32
    %c0_i32_0 = arith.constant 0 : i32
    %c0_i32_1 = arith.constant 0 : i32
    return %arg0, %arg1, %c0_i32, %c0_i32_0 : i32, i32, i32, i32
  }
  func.func @transform_2(%arg0: i32, %arg1: i32) -> (i32, i32, i32, i32) {
    %c0_i32 = arith.constant 0 : i32
    %c0_i32_0 = arith.constant 0 : i32
    %c0_i32_1 = arith.constant 0 : i32
    return %arg0, %arg1, %c0_i32, %c0_i32_0 : i32, i32, i32, i32
  }
  func.func @transform_3(%arg0: i32, %arg1: i32) -> (i32, i32, i32) {
    %c0_i32 = arith.constant 0 : i32
    %c0_i32_0 = arith.constant 0 : i32
    %c0_i32_1 = arith.constant 0 : i32
    %c0_i32_2 = arith.constant 0 : i32
    return %c0_i32, %c0_i32_0, %c0_i32_1 : i32, i32, i32
  }
  func.func @transform_4(%arg0: i32, %arg1: i32) -> (i32, i32, i32) {
    %c0_i32 = arith.constant 0 : i32
    %c0_i32_0 = arith.constant 0 : i32
    %c0_i32_1 = arith.constant 0 : i32
    %c0_i32_2 = arith.constant 0 : i32
    return %c0_i32, %c0_i32_0, %c0_i32_1 : i32, i32, i32
  }
  func.func @transform_5(%arg0: i32, %arg1: i32) -> (i32, i32, i32, i32) {
    %c0_i32 = arith.constant 0 : i32
    %c0_i32_0 = arith.constant 0 : i32
    %c0_i32_1 = arith.constant 0 : i32
    return %arg0, %arg1, %c0_i32, %c0_i32_0 : i32, i32, i32, i32
  }
}

</mosaic_0001>

<bundles_post_ra>
// kernel: tpu_custom_call.1
= control target key start
LH: loop header
LB: loop body
LE: loop exit
PB: predicated region body
PF: predicated region fallthrough
CT: control target
= control target key end

     0   :  { %10 = vsyncpa [#allocation3], 0  ;;  %s1612_s0 = inlined_call_operand.vmem [shape: f32[4,2,64,64], index: 0, kind: input, shape index: {}]   ;;  %s1613_s1 = inlined_call_operand.vmem [shape: f32[4,2,96,64], index: 1, kind: input, shape index: {}]   ;;  %s1614_s2 = inlined_call_operand.vmem [shape: f32[4,2,96,64], index: 2, kind: input, shape index: {}]   ;;  %s1615_s3 = inlined_call_operand.vmem [shape: f32[1,64,96], index: 3, kind: input, shape index: {}]   ;;  %s1616_s4 = inlined_call_operand.vmem [shape: f32[1,64,96], index: 4, kind: input, shape index: {}]   ;;  %s1617_s5 = inlined_call_operand.hbm [shape: f32[4,2,64,64], index: 5, kind: output, shape index: {}]  }
   0x1   :  { %12 = vsyncpa [#allocation3 + $0x1], 0  ;;  %s1228_s18 = smov 0   ;;  %s1230_s19 = smov 0  }
   0x2   :  { %s1232_s20 = smov 0   ;;  %s1234_s21 = smov 0  }
   0x3   :  { %s1236_s22 = smov 0   ;;  %s1238_s23 = smov 0  }
   0x4   :  { %s1240_s24 = smov 0   ;;  %s1242_s25 = smov 0  }
   0x5 LB: > { %s912_s26 = sadd.s32 4294967295, %s1194_s25   ;;  %s913_s27 = sadd.s32 4294967294, %s1194_s25   ;;  %s1194_s25 = sphi %s1242_s25, %s18_s25   ;;  %s1190_s24 = sphi %s1240_s24, %s1630_s24   ;;  %s1186_s23 = sphi %s1238_s23, %s1629_s23   ;;  %s1182_s22 = sphi %s1236_s22, %s1628_s22   ;;  %s1178_s21 = sphi %s1234_s21, %s1627_s21   ;;  %s1174_s20 = sphi %s1232_s20, %s1626_s20   ;;  %s1170_s19 = sphi %s1230_s19, %s1625_s19   ;;  %s1166_s18 = sphi %s1228_s18, %s1624_s18  }
   0x6   : > { %s27_s28 = sadd.s32 1, %s1186_s23  ;;  %s30_s29 = sadd.s32 1, %s1190_s24 }
   0x7   : > { %p28_p0 = scmp.ge.s32.totalorder %s27_s28, 2  ;;  %p175_p1 = scmp.ne.s32.totalorder %s1174_s20, %s1170_s19 }
   0x8   : > { %p176_p2 = scmp.eq.s32.totalorder %s912_s26, 7  ;;  %p181_p5 = scmp.ne.s32.totalorder %s1170_s19, %s1166_s18 }
   0x9   : > { %s1632_s28 = smov (%p28_p0, %s27_s28), 0  ;;  %s1634_s29 = smov (!%p28_p0, %s30_s29), %s1190_s24 }
   0xa   : > { %s161_s30 = ssub.s32 %s1186_s23, %s1632_s28  ;;  %p1279_p3 = por %p176_p2, %p175_p1 }
   0xb   : > { %p32_p4 = scmp.ge.s32.totalorder %s1634_s29, 4  ;;  %p182_p6 = scmp.eq.s32.totalorder %s913_s27, 7 }
   0xc   : > { %p916_p7 = scmp.ge.s32.totalorder %s1194_s25, 1  ;;  %p242_p9 = scmp.lt.s32.totalorder %s1194_s25, 9 }
   0xd   : > { %s1636_s29 = smov (%p32_p4, %s1634_s29), 0  ;;  %p1288_p8 = por %p182_p6, %p181_p5 }
   0xe   : > { %s160_s8 = ssub.s32 %s1190_s24, %s1636_s29  ;;  %s165_s9 = sadd.s32 1, %s1174_s20 }
   0xf   : > { %s162_s10 = sor.u32 %s161_s30, %s160_s8  ;;  %p243_p10 = pnand %p916_p7, %p242_p9 }
  0x10   : > { %p163_p11 = scmp.eq.s32.totalorder %s162_s10, 0  ;;  %p292_p12 = scmp.lt.s32.totalorder (!%p243_p10), %s1182_s22, 3 }
  0x11   : > { %246 = sbr.rel (%p243_p10) target bundleno = 521 (0x209), region = 40  ;;  %p294_p13 = scmp.lt.s32.totalorder (!%p243_p10), %s1178_s21, 1 }
  0x12   : > { %s1297_s11 = scalar_select %p163_p11, %s1174_s20, %s165_s9  }
  0x16   : > { %s1302_s12 = scalar_select %p292_p12, %s1182_s22, 3  ;;  %vm359_vm0 = vcmask 523264   ;;  %v462_v29 = vld [vmem:[%s1615_s3 + $0x8] sm:$0xff]  ;;  %v463_v32 = vld [vmem:[%s1615_s3 + $0x10] sm:$0xff]  ;;  %vm493_vm2 = vcmask 785408   ;;  %v464_v35 = vld [vmem:[%s1615_s3 + $0x18] sm:$0xff] }
  0x17   : > { %s1305_s13 = scalar_select %p294_p13, %s1178_s21, 1  ;;  %vm470_vm1 = vcmp.gt.f32.partialorder %v462_v29, 0.5  ;;  %v478_v31 = vld [vmem:[%s1616_s4 + $0x8] sm:$0xff]  ;;  %vm471_vm3 = vcmp.gt.f32.partialorder %v463_v32, 0.5  ;;  %v479_v39 = vld [vmem:[%s1616_s4 + $0x10] sm:$0xff]  ;;  %vm472_vm4 = vcmp.gt.f32.partialorder %v464_v35, 0.5 }
  0x18   : > { %s994_s14 = smul.u32 24, %s1302_s12  ;;  %s919_s9 = sshll.u32 %s1302_s12, 4  ;;  %v480_v41 = vld [vmem:[%s1616_s4 + $0x18] sm:$0xff]  ;;  %v465_v50 = vld [vmem:[%s1615_s3 + $0x20] sm:$0xff]  ;;  %v466_v62 = vld [vmem:[%s1615_s3 + $0x28] sm:$0xff] }
  0x19   : > { %s993_s15 = smul.u32 12, %s1305_s13  ;;  %s918_s8 = sshll.u32 %s1305_s13, 3  ;;  %v461_v51 = vld [vmem:[%s1615_s3] sm:$0xff]  ;;  %vm473_vm5 = vcmp.gt.f32.partialorder %v465_v50, 0.5  ;;  %v468_v55 = vld [vmem:[%s1615_s3 + $0x38] sm:$0xff]  ;;  %vm474_vm8 = vcmp.gt.f32.partialorder %v466_v62, 0.5 }
  0x1a   : > { %s298_s10 = sadd.s32 %s919_s9, %s918_s8  ;;  %v481_v53 = vld [vmem:[%s1616_s4 + $0x20] sm:$0xff]  ;;  %vm469_vm6 = vcmp.gt.f32.partialorder %v461_v51, 0.5  ;;  %vm476_vm7 = vcmp.gt.f32.partialorder %v468_v55, 0.5  ;;  %v484_v61 = vld [vmem:[%s1616_s4 + $0x38] sm:$0xff]  ;;  %s952_s8 = sshll.u32 %s1178_s21, 3 }
  0x1b   : > { %s1309_s16 = sadd.s32 %s994_s14, %s993_s15  ;;  %s920_s14 = sshll.u32 %s298_s10, 3  ;;  %v477_v54 = vld [vmem:[%s1616_s4] sm:$0xff] }
  0x1c   : > { %s921_s17 = sshll.u32 %s1309_s16, 3  ;;  %s300_s15 = scalar_lea.vmem %s1612_s0, %s920_s14 }
  0x1d   : > { %s1317_s30 = scalar_lea.vmem %s1613_s1, %s921_s17  ;;  %v319_v11 = vld [vmem:[%s300_s15] sm:$0xff]  ;;  %v321_v12 = vld [vmem:[%s300_s15 + $0x10] sm:$0xff]  ;;  %v320_v18 = vld [vmem:[%s300_s15 + $0x8] sm:$0xff]  ;;  %s1391_s14 = scalar_lea.vmem %s1614_s2, %s921_s17 }
  0x1e   : > { %v346_v0 = vld [vmem:[%s1317_s30 + $0x58] sm:$0xff]  ;;  %v345_v1 = vld [vmem:[%s1317_s30 + $0x50] sm:$0xff]  ;;  %v344_v2 = vld [vmem:[%s1317_s30 + $0x48] sm:$0xff]  ;;  %v327_v15 = vmul.f32 0.125, %v319_v11  ;;  %v329_v16 = vmul.f32 0.125, %v321_v12  ;;  %v328_v21 = vmul.f32 0.125, %v320_v18 }
  0x1f   : > { %923 = vmatpush.xpose.msk.msra.mxu0 %vm359_vm0, %v346_v0  ;;  %957 = vmatpush.xpose.msk.msra.mxu2 %vm359_vm0, %v346_v0  ;;  %v343_v3 = vld [vmem:[%s1317_s30 + $0x40] sm:$0xff]  ;;  %v342_v4 = vld [vmem:[%s1317_s30 + $0x38] sm:$0xff]  ;;  %v341_v5 = vld [vmem:[%s1317_s30 + $0x30] sm:$0xff]  ;;  %s953_s9 = sshll.u32 %s1182_s22, 4 }
  0x20   : > { %958 = vmatpush.xpose.msk.msra.mxu3 %vm359_vm0, %v346_v0  ;;  %v340_v6 = vld [vmem:[%s1317_s30 + $0x28] sm:$0xff]  ;;  %v339_v7 = vld [vmem:[%s1317_s30 + $0x20] sm:$0xff]  ;;  %v338_v8 = vld [vmem:[%s1317_s30 + $0x18] sm:$0xff]  ;;  %s779_s10 = sadd.s32 %s953_s9, %s952_s8 }
  0x21   : > { %v337_v9 = vld [vmem:[%s1317_s30 + $0x10] sm:$0xff]  ;;  %v336_v10 = vld [vmem:[%s1317_s30 + $0x8] sm:$0xff]  ;;  %v335_v13 = vld [vmem:[%s1317_s30] sm:$0xff]  ;;  %s954_s21 = sshll.u32 %s779_s10, 3  ;;  %s1120_s10 = scalar_lea.hbm %s1617_s5, 512 }
  0x22   : > { %v325_v14 = vld [vmem:[%s300_s15 + $0x30] sm:$0xff]  ;;  %v322_v19 = vld [vmem:[%s300_s15 + $0x18] sm:$0xff]  ;;  %v323_v24 = vld [vmem:[%s300_s15 + $0x20] sm:$0xff]  ;;  %s781_s12 = scalar_lea.hbm %s1617_s5, %s954_s21 }
  0x23   : > { %924 = vmatpush.xpose.msk.msra.mxu0 %vm359_vm0, %v345_v1  ;;  %959 = vmatpush.xpose.msk.msra.mxu2 %vm359_vm0, %v345_v1  ;;  %v333_v17 = vmul.f32 0.125, %v325_v14  ;;  %v326_v20 = vld [vmem:[%s300_s15 + $0x38] sm:$0xff]  ;;  %v330_v22 = vmul.f32 0.125, %v322_v19  ;;  %v331_v25 = vmul.f32 0.125, %v323_v24  ;;  %v324_v26 = vld [vmem:[%s300_s15 + $0x28] sm:$0xff]  ;;  %v357_v37 = vld [vmem:[%s1391_s14 + $0x50] sm:$0xff] }
  0x24   : > { %960 = vmatpush.xpose.msk.msra.mxu3 %vm359_vm0, %v345_v1  ;;  %v334_v23 = vmul.f32 0.125, %v326_v20  ;;  %v332_v27 = vmul.f32 0.125, %v324_v26  ;;  %v358_v36 = vld [vmem:[%s1391_s14 + $0x58] sm:$0xff]  ;;  %v356_v40 = vld [vmem:[%s1391_s14 + $0x48] sm:$0xff]  ;;  %v355_v43 = vld [vmem:[%s1391_s14 + $0x40] sm:$0xff]  ;;  %s784_s26 = sshll.u32 %s781_s12, 4  ;;  %s785_s26 = int_to_ptr.hbm [resolvable:$true] %s784_s26 }
  0x25   : > { %981 = vmatpush.msra.mxu1 %v358_v36  ;;  %v354_v47 = vld [vmem:[%s1391_s14 + $0x38] sm:$0xff]  ;;  %v353_v52 = vld [vmem:[%s1391_s14 + $0x30] sm:$0xff]  ;;  %v482_v1 = vld [vmem:[%s1616_s4 + $0x28] sm:$0xff]  ;;  %s1114_s17 = sshra.s32 %s785_s26, 4  ;;  %s1115_s17 = int_to_ptr.hbm [resolvable:$true] %s1114_s17 }
  0x26   : > { %v351_v11 = vld [vmem:[%s1391_s14 + $0x20] sm:$0xff]  ;;  %v350_v12 = vld [vmem:[%s1391_s14 + $0x18] sm:$0xff]  ;;  %v348_v14 = vld [vmem:[%s1391_s14 + $0x8] sm:$0xff]  ;;  %p1121_p4 = scmp.lt.s32.totalorder %s1115_s17, %s1617_s5 }
  0x27   : > { %925 = vmatpush.xpose.msk.msra.mxu0 %vm359_vm0, %v344_v2  ;;  %961 = vmatpush.xpose.msk.msra.mxu2 %vm359_vm0, %v344_v2 }
  0x28   : > { %962 = vmatpush.xpose.msk.msra.mxu3 %vm359_vm0, %v344_v2  ;;  %982 = vmatpush.msra.mxu1 %v357_v37  ;;  %v467_v2 = vld [vmem:[%s1615_s3 + $0x30] sm:$0xff] }
  0x29   : > { %vm475_vm9 = vcmp.gt.f32.partialorder %v467_v2, 0.5 }
  0x2a   : > { %983 = vmatpush.msra.mxu1 %v356_v40 }
  0x2b   : > { %926 = vmatpush.xpose.msk.msra.mxu0 %vm359_vm0, %v343_v3  ;;  %963 = vmatpush.xpose.msk.msra.mxu2 %vm359_vm0, %v343_v3 }
  0x2c   : > { %964 = vmatpush.xpose.msk.msra.mxu3 %vm359_vm0, %v343_v3  ;;  %984 = vmatpush.msra.mxu1 %v355_v43 }
  0x2e   : > { %985 = vmatpush.msra.mxu1 %v354_v47 }
  0x2f   : > { %927 = vmatpush.xpose.msk.msra.mxu0 %vm359_vm0, %v342_v4  ;;  %965 = vmatpush.xpose.msk.msra.mxu2 %vm359_vm0, %v342_v4 }
  0x30   : > { %966 = vmatpush.xpose.msk.msra.mxu3 %vm359_vm0, %v342_v4  ;;  %986 = vmatpush.msra.mxu1 %v353_v52 }
  0x33   : > { %928 = vmatpush.xpose.msk.msra.mxu0 %vm359_vm0, %v341_v5  ;;  %967 = vmatpush.xpose.msk.msra.mxu2 %vm359_vm0, %v341_v5 }
  0x34   : > { %968 = vmatpush.xpose.msk.msra.mxu3 %vm359_vm0, %v341_v5 }
  0x37   : > { %929 = vmatpush.xpose.msk.msra.mxu0 %vm359_vm0, %v340_v6  ;;  %969 = vmatpush.xpose.msk.msra.mxu2 %vm359_vm0, %v340_v6 }
  0x38   : > { %970 = vmatpush.xpose.msk.msra.mxu3 %vm359_vm0, %v340_v6 }
  0x3b   : > { %930 = vmatpush.xpose.msk.msra.mxu0 %vm359_vm0, %v339_v7  ;;  %971 = vmatpush.xpose.msk.msra.mxu2 %vm359_vm0, %v339_v7 }
  0x3c   : > { %972 = vmatpush.xpose.msk.msra.mxu3 %vm359_vm0, %v339_v7  ;;  %v483_v7 = vld [vmem:[%s1616_s4 + $0x30] sm:$0xff] }
  0x3f   : > { %931 = vmatpush.xpose.msk.msra.mxu0 %vm359_vm0, %v338_v8  ;;  %973 = vmatpush.xpose.msk.msra.mxu2 %vm359_vm0, %v338_v8 }
  0x40   : > { %974 = vmatpush.xpose.msk.msra.mxu3 %vm359_vm0, %v338_v8 }
  0x43   : > { %932 = vmatpush.xpose.msk.msra.mxu0 %vm359_vm0, %v337_v9  ;;  %975 = vmatpush.xpose.msk.msra.mxu2 %vm359_vm0, %v337_v9 }
  0x44   : > { %976 = vmatpush.xpose.msk.msra.mxu3 %vm359_vm0, %v337_v9 }
  0x47   : > { %933 = vmatpush.xpose.msk.msra.mxu0 %vm359_vm0, %v336_v10  ;;  %977 = vmatpush.xpose.msk.msra.mxu2 %vm359_vm0, %v336_v10 }
  0x48   : > { %978 = vmatpush.xpose.msk.msra.mxu3 %vm359_vm0, %v336_v10  ;;  %v352_v10 = vld [vmem:[%s1391_s14 + $0x28] sm:$0xff] }
  0x49   : > { %987 = vmatpush.msra.mxu1 %v352_v10 }
  0x4b   : > { %934 = vmatpush.xpose.msk.msra.mxu0 %vm359_vm0, %v335_v13  ;;  %979 = vmatpush.xpose.msk.msra.mxu2 %vm359_vm0, %v335_v13 }
  0x4c   : > { %980 = vmatpush.xpose.msk.msra.mxu3 %vm359_vm0, %v335_v13  ;;  %988 = vmatpush.msra.mxu1 %v351_v11  ;;  %v349_v13 = vld [vmem:[%s1391_s14 + $0x10] sm:$0xff] }
  0x4e   : > { %935 = vmatmul.msk.f32.vlgmr.msra.gmra.mxu0 %vm359_vm0, %v327_v15  ;;  %937 = vmatmul.msk.f32.vlgmr.msra.gmra.mxu2 %vm359_vm0, %v329_v16  ;;  %v347_v15 = vld [vmem:[%s1391_s14] sm:$0xff]  ;;  %s289_s14 = sand.u32 1, %s1170_s19  }
  0x4f   : > { %941 = vmatmul.msk.f32.vlgmr.msra.gmra.mxu3 %vm359_vm0, %v333_v17  ;;  %594 = vmatpush.msrb.mxu0 %v358_v36  ;;  %s917_s27 = sshll.u32 %s289_s14, 6  ;;  %s768_s16 = scalar_lea.sflag [#allocation3], %s289_s14 }
  0x50   : > { %989 = vmatpush.msra.mxu1 %v350_v12  ;;  %s1501_s30 = scalar_lea.vmem [#allocation2], %s917_s27  ;;  %s1116_s27 = scalar_lea.hbm %s1115_s17, 64 }
  0x51   : > { %595 = vmatpush.msrb.mxu0 %v357_v37  ;;  %s782_s15 = sshll.u32 %s1501_s30, 4  ;;  %p1117_p0 = scmp.ne.s32.totalorder %s1115_s17, %s1116_s27  ;;  %s783_s15 = int_to_ptr.vmem [resolvable:$true] %s782_s15 }
  0x52   : > { %990 = vmatpush.msra.mxu1 %v349_v13  ;;  %p1122_p5 = scmp.lt.s32.totalorder %s1120_s10, %s1116_s27 }
  0x53   : > { %596 = vmatpush.msrb.mxu0 %v356_v40  ;;  %p1118_p1 = pnand %p1117_p0, %p1279_p3 }
  0x54   : > { %991 = vmatpush.msra.mxu1 %v348_v14  ;;  %p1123_p6 = por %p1122_p5, %p1121_p4 }
  0x55   : > { %597 = vmatpush.msrb.mxu0 %v355_v43  ;;  %p1119_p2 = pneg %p1118_p1 }
  0x56   : > { %936 = vmatmul.msk.f32.gmra.mxu0 %vm359_vm0, %v328_v21  ;;  %938 = vmatmul.msk.f32.gmra.mxu2 %vm359_vm0, %v330_v22 }
  0x57   : > { %942 = vmatmul.msk.f32.gmra.mxu3 %vm359_vm0, %v334_v23  ;;  %598 = vmatpush.msrb.mxu0 %v354_v47  ;;  %p1124_p7 = pnand %p1123_p6, %p1119_p2 }
  0x58   : > { %992 = vmatpush.msra.mxu1 %v347_v15 }
  0x59   : > { %599 = vmatpush.msrb.mxu0 %v353_v52 }
  0x5b   : > { %600 = vmatpush.msrb.mxu0 %v352_v10 }
  0x5d   : > { %601 = vmatpush.msrb.mxu0 %v351_v11 }
  0x5e   : > { %939 = vmatmul.msk.f32.gmra.mxu2 %vm359_vm0, %v331_v25 }
  0x5f   : > { %602 = vmatpush.msrb.mxu0 %v350_v12 }
  0x61   : > { %603 = vmatpush.msrb.mxu0 %v349_v13 }
  0x63   : > { %604 = vmatpush.msrb.mxu0 %v348_v14 }
  0x65   : > { %605 = vmatpush.msrb.mxu0 %v347_v15 }
  0x66   : > { %940 = vmatmul.msk.f32.gmra.mxu2 %vm359_vm0, %v332_v27 }
  0xcb   : > { %v437_v28 = vpop.f32.mrf.mxu0 }
  0xcc   : > { %v1438_v58 = vsel %vm469_vm6, %v437_v28, %v477_v54 }
  0xcd   : > { %v494_v63 = vsel %vm493_vm2, %v1438_v58, -inf }
  0xd1   : > { %v443_v30 = vpop.f32.mrf.mxu2 }
  0xd2   : > { %v1412_v42 = vsel %vm471_vm3, %v443_v30, %v479_v39  ;;  %v455_v45 = vpop.f32.mrf.mxu3 }
  0xd3   : > { %v440_v33 = vpop.f32.mrf.mxu0  ;;  %v500_v49 = vsel %vm493_vm2, %v1412_v42, -inf  ;;  %v1463_v8 = vsel %vm475_vm9, %v455_v45, %v483_v7 }
  0xd4   : > { %v1396_v34 = vsel %vm470_vm1, %v440_v33, %v478_v31  ;;  %v512_v9 = vsel %vm493_vm2, %v1463_v8, -inf }
  0xd5   : > { %v497_v38 = vsel %vm493_vm2, %v1396_v34, -inf }
  0xd6   : > { %498 = vmax.xlane.f32.xlu0 %v497_v38 }
  0xd9   : > { %v446_v44 = vpop.f32.mrf.mxu2 }
  0xda   : > { %v1415_v46 = vsel %vm472_vm4, %v446_v44, %v480_v41  ;;  %v458_v60 = vpop.f32.mrf.mxu3 }
  0xdb   : > { %v503_v48 = vsel %vm493_vm2, %v1415_v46, -inf  ;;  %v1449_v0 = vsel %vm476_vm7, %v458_v60, %v484_v61 }
  0xdc   : > { %504 = vmax.xlane.f32.xlu1 %v503_v48  ;;  %v515_v4 = vsel %vm493_vm2, %v1449_v0, -inf }
  0xde   : > { %501 = vmax.xlane.f32.xlu0 %v500_v49 }
  0xe1   : > { %v449_v56 = vpop.f32.mrf.mxu2 }
  0xe2   : > { %v489_v57 = vsel %vm473_vm5, %v449_v56, %v481_v53 }
  0xe3   : > { %v506_v59 = vsel %vm493_vm2, %v489_v57, -inf }
  0xe4   : > { %507 = vmax.xlane.f32.xlu1 %v506_v59 }
  0xe6   : > { %495 = vmax.xlane.f32.xlu0 %v494_v63 }
  0xe9   : > { %v452_v3 = vpop.f32.mrf.mxu2 }
  0xea   : > { %v490_v5 = vsel %vm474_vm8, %v452_v3, %v482_v1 }
  0xeb   : > { %v509_v6 = vsel %vm493_vm2, %v490_v5, -inf }
  0xec   : > { %516 = vmax.xlane.f32.xlu1 %v515_v4  ;;  %510 = vmax.xlane.f32.xlu2 %v509_v6 }
  0xf4   : > { %513 = vmax.xlane.f32.xlu2 %v512_v9 }
 0x149   : > { %v499_v16 = vpop.xlane.xlu0 %498 }
 0x14a   : > { %v519_v17 = vsub.f32 %v1396_v34, %v499_v16 }
 0x14c   : > { %v528_v18 = vmul.f32 1.442695, %v519_v17 }
 0x14e   : > { %1068 = vpow2.f32 %v528_v18 }
 0x14f   : > { %v505_v19 = vpop.xlane.xlu1 %504 }
 0x150   : > { %v521_v24 = vsub.f32 %v1415_v46, %v505_v19 }
 0x151   : > { %v502_v20 = vpop.xlane.xlu0 %501 }
 0x152   : > { %v520_v21 = vsub.f32 %v1412_v42, %v502_v20  ;;  %v532_v28 = vmul.f32 1.442695, %v521_v24 }
 0x154   : > { %v1069_v22 = vpop.eup %1068  ;;  %v530_v23 = vmul.f32 1.442695, %v520_v21 }
 0x155   : > { %944 = vmatmul.msk.f32.vlgmr.msra.gmra.mxu1 %vm493_vm2, %v1069_v22  ;;  %v545_v25 = vsel %vm493_vm2, %v1069_v22, 0.0 }
 0x156   : > { %1070 = vpow2.f32 %v530_v23  ;;  %546 = vadd.xlane.f32.xlu0 %v545_v25 }
 0x157   : > { %v508_v26 = vpop.xlane.xlu1 %507 }
 0x158   : > { %v522_v27 = vsub.f32 %v489_v57, %v508_v26 }
 0x159   : > { %v496_v29 = vpop.xlane.xlu0 %495 }
 0x15a   : > { %v534_v30 = vmul.f32 1.442695, %v522_v27  ;;  %v518_v31 = vsub.f32 %v1438_v58, %v496_v29 }
 0x15c   : > { %v1071_v32 = vpop.eup %1070  ;;  %1072 = vpow2.f32 %v534_v30  ;;  %v526_v33 = vmul.f32 1.442695, %v518_v31 }
 0x15d   : > { %1074 = vpow2.f32 %v532_v28  ;;  %945 = vmatmul.msk.f32.gmra.mxu1 %vm493_vm2, %v1071_v32  ;;  %v548_v34 = vsel %vm493_vm2, %v1071_v32, 0.0 }
 0x15e   : > { %1076 = vpow2.f32 %v526_v33  ;;  %549 = vadd.xlane.f32.xlu1 %v548_v34 }
 0x15f   : > { %v517_v35 = vpop.xlane.xlu1 %516  ;;  %v511_v36 = vpop.xlane.xlu2 %510 }
 0x160   : > { %v525_v37 = vsub.f32 %v1449_v0, %v517_v35  ;;  %v523_v38 = vsub.f32 %v490_v5, %v511_v36 }
 0x162   : > { %v1073_v39 = vpop.eup %1072  ;;  %v540_v40 = vmul.f32 1.442695, %v525_v37  ;;  %v536_v41 = vmul.f32 1.442695, %v523_v38 }
 0x163   : > { %v1075_v42 = vpop.eup %1074  ;;  %v554_v43 = vsel %vm493_vm2, %v1073_v39, 0.0 }
 0x164   : > { %v1077_v44 = vpop.eup %1076  ;;  %1078 = vpow2.f32 %v540_v40  ;;  %555 = vadd.xlane.f32.xlu0 %v554_v43  ;;  %v551_v53 = vsel %vm493_vm2, %v1075_v42, 0.0 }
 0x165   : > { %1080 = vpow2.f32 %v536_v41  ;;  %943 = vmatmul.msk.f32.vlgmr.msrb.gmra.mxu0 %vm493_vm2, %v1077_v44  ;;  %946 = vmatmul.msk.f32.gmra.mxu1 %vm493_vm2, %v1075_v42  ;;  %v542_v45 = vsel %vm493_vm2, %v1077_v44, 0.0 }
 0x166   : > { %543 = vadd.xlane.f32.xlu2 %v542_v45 }
 0x167   : > { %v514_v46 = vpop.xlane.xlu2 %513 }
 0x168   : > { %v524_v47 = vsub.f32 %v1463_v8, %v514_v46 }
 0x16a   : > { %v1079_v48 = vpop.eup %1078  ;;  %v538_v49 = vmul.f32 1.442695, %v524_v47 }
 0x16b   : > { %v1081_v50 = vpop.eup %1080  ;;  %v563_v51 = vsel %vm493_vm2, %v1079_v48, 0.0 }
 0x16c   : > { %1082 = vpow2.f32 %v538_v49  ;;  %564 = vadd.xlane.f32.xlu0 %v563_v51  ;;  %v557_v52 = vsel %vm493_vm2, %v1081_v50, 0.0 }
 0x16d   : > { %558 = vadd.xlane.f32.xlu1 %v557_v52  ;;  %947 = vmatmul.msk.f32.gmra.mxu1 %vm493_vm2, %v1073_v39 }
 0x16e   : > { %552 = vadd.xlane.f32.xlu2 %v551_v53 }
 0x172   : > { %v1083_v54 = vpop.eup %1082 }
 0x173   : > { %v560_v55 = vsel %vm493_vm2, %v1083_v54, 0.0 }
 0x175   : > { %948 = vmatmul.msk.f32.gmra.mxu1 %vm493_vm2, %v1081_v50 }
 0x176   : > { %561 = vadd.xlane.f32.xlu2 %v560_v55 }
 0x17d   : > { %949 = vmatmul.msk.f32.gmra.mxu1 %vm493_vm2, %v1083_v54 }
 0x185   : > { %950 = vmatmul.msk.f32.gmra.mxu1 %vm493_vm2, %v1079_v48 }
 0x1c9   : > { %v547_v56 = vpop.xlane.xlu0 %546 }
 0x1ca   : > { %1084 = vrcp.f32 %v547_v56  ;;  %v657_v62 = vand.u32 2147483648, %v547_v56  ;;  %v655_v0 = vand.u32 2147483647, %v547_v56  ;;  %vm651_vm11 = vweird.f32 %v547_v56 }
 0x1cc   : > { %v658_v4 = vor.u32 1.1754944e-38, %v657_v62  ;;  %vm656_vm13 = vcmp.eq.f32.partialorder %v655_v0, 8.507059e+37 }
 0x1d0   : > { %v1085_v57 = vpop.eup %1084 }
 0x1d1   : > { %v647_v58 = vmul.f32 %v1085_v57, %v547_v56  ;;  %v550_v59 = vpop.xlane.xlu1 %549  ;;  %vm652_vm10 = vweird.f32 %v1085_v57 }
 0x1d2   : > { %1086 = vrcp.f32 %v550_v59  ;;  %v610_v60 = vpop.f32.mrf.mxu1  ;;  %vm653_vm12 = vmor %vm651_vm11, %vm652_vm10  ;;  %v670_v12 = vand.u32 2147483647, %v550_v59  ;;  %v672_v13 = vand.u32 2147483648, %v550_v59  ;;  %vm666_vm15 = vweird.f32 %v550_v59 }
 0x1d3   : > { %v648_v61 = vsub.f32 1.0, %v647_v58 }
 0x1d4   : > { %vm671_vm2 = vcmp.eq.f32.partialorder %v670_v12, 8.507059e+37  ;;  %v673_v19 = vor.u32 1.1754944e-38, %v672_v13 }
 0x1d5   : > { %v649_v63 = vmul.f32 %v1085_v57, %v648_v61 }
 0x1d7   : > { %v650_v1 = vadd.f32 %v1085_v57, %v649_v63  ;;  %v1498_v2 = vpop.xlane.xlu0 %555 }
 0x1d8   : > { %v1087_v3 = vpop.eup %1086  ;;  %1088 = vrcp.f32 %v1498_v2  ;;  %v700_v32 = vand.u32 2147483647, %v1498_v2  ;;  %vm696_vm5 = vweird.f32 %v1498_v2  ;;  %v702_v36 = vand.u32 2147483648, %v1498_v2 }
 0x1d9   : > { %v662_v5 = vmul.f32 %v1087_v3, %v550_v59  ;;  %v654_v6 = vsel %vm653_vm12, %v1085_v57, %v650_v1  ;;  %v544_v7 = vpop.xlane.xlu2 %543  ;;  %vm667_vm14 = vweird.f32 %v1087_v3 }
 0x1da   : > { %v659_v8 = vsel %vm656_vm13, %v658_v4, %v654_v6  ;;  %1090 = vrcp.f32 %v544_v7  ;;  %v613_v9 = vpop.f32.mrf.mxu1  ;;  %vm668_vm1 = vmor %vm666_vm15, %vm667_vm14  ;;  %v642_v30 = vand.u32 2147483648, %v544_v7  ;;  %v640_v34 = vand.u32 2147483647, %v544_v7 }
 0x1db   : > { %v663_v10 = vsub.f32 1.0, %v662_v5  ;;  %v752_v11 = vmul.f32 %v659_v8, %v610_v60  ;;  %vm636_vm6 = vweird.f32 %v544_v7  ;;  %vm1527_vm9 = vcmp.eq.f32.partialorder %v700_v32, 8.507059e+37 }
 0x1dc   : > { %v643_v42 = vor.u32 1.1754944e-38, %v642_v30  ;;  %vm641_vm10 = vcmp.eq.f32.partialorder %v640_v34, 8.507059e+37  ;;  %v703_v52 = vor.u32 1.1754944e-38, %v702_v36 }
 0x1dd   : > { %760 = vst.msk [vmem:[%s1501_s30 + $0x8] sm:$0xff] %vm359_vm0, %v752_v11  ;;  %v664_v14 = vmul.f32 %v1087_v3, %v663_v10 }
 0x1de   : > { %v1089_v15 = vpop.eup %1088 }
 0x1df   : > { %v692_v16 = vmul.f32 %v1089_v15, %v1498_v2  ;;  %v665_v17 = vadd.f32 %v1087_v3, %v664_v14  ;;  %v1514_v29 = vpop.xlane.xlu0 %564  ;;  %vm697_vm3 = vweird.f32 %v1089_v15 }
 0x1e0   : > { %v1091_v18 = vpop.eup %1090  ;;  %v1506_v20 = vpop.xlane.xlu1 %558  ;;  %vm1522_vm7 = vmor %vm696_vm5, %vm697_vm3 }
 0x1e1   : > { %v693_v21 = vsub.f32 1.0, %v692_v16  ;;  %v632_v22 = vmul.f32 %v1091_v18, %v544_v7  ;;  %v669_v23 = vsel %vm668_vm1, %v1087_v3, %v665_v17  ;;  %1092 = vrcp.f32 %v1506_v20  ;;  %v1509_v24 = vpop.xlane.xlu2 %552 }
 0x1e2   : > { %v674_v25 = vsel %vm671_vm2, %v673_v19, %v669_v23  ;;  %1094 = vrcp.f32 %v1509_v24  ;;  %v1512_v26 = vpop.f32.mrf.mxu1  ;;  %vm637_vm4 = vweird.f32 %v1091_v18  ;;  %v607_v49 = vpop.f32.mrf.mxu0  ;;  %v717_v53 = vand.u32 2147483648, %v1506_v20 }
 0x1e3   : > { %v633_v27 = vsub.f32 1.0, %v632_v22  ;;  %v753_v28 = vmul.f32 %v674_v25, %v613_v9  ;;  %v694_v31 = vmul.f32 %v1089_v15, %v693_v21  ;;  %1096 = vrcp.f32 %v1514_v29  ;;  %vm638_vm8 = vmor %vm636_vm6, %vm637_vm4 }
 0x1e4   : > { %v685_v56 = vand.u32 2147483647, %v1509_v24  ;;  %v687_v59 = vand.u32 2147483648, %v1509_v24  ;;  %v715_v63 = vand.u32 2147483647, %v1506_v20  ;;  %vm711_vm13 = vweird.f32 %v1506_v20 }
 0x1e5   : > { %761 = vst.msk [vmem:[%s1501_s30 + $0x10] sm:$0xff] %vm359_vm0, %v753_v28  ;;  %v634_v33 = vmul.f32 %v1091_v18, %v633_v27  ;;  %v695_v35 = vadd.f32 %v1089_v15, %v694_v31  ;;  %vm681_vm14 = vweird.f32 %v1509_v24  ;;  %v718_v6 = vor.u32 1.1754944e-38, %v717_v53 }
 0x1e6   : > { %v688_v4 = vor.u32 1.1754944e-38, %v687_v59  ;;  %vm686_vm2 = vcmp.eq.f32.partialorder %v685_v56, 8.507059e+37  ;;  %vm716_vm3 = vcmp.eq.f32.partialorder %v715_v63, 8.507059e+37  ;;  %v747_v27 = vand.u32 2147483648, %v1514_v29 }
 0x1e7   : > { %v1093_v37 = vpop.eup %1092  ;;  %v635_v38 = vadd.f32 %v1091_v18, %v634_v33  ;;  %v699_v47 = vsel %vm1522_vm7, %v1089_v15, %v695_v35  ;;  %v745_v28 = vand.u32 2147483647, %v1514_v29 }
 0x1e8   : > { %v1095_v40 = vpop.eup %1094  ;;  %v707_v41 = vmul.f32 %v1093_v37, %v1506_v20  ;;  %v704_v60 = vsel %vm1527_vm9, %v703_v52, %v699_v47  ;;  %vm712_vm11 = vweird.f32 %v1093_v37  ;;  %vm741_vm9 = vweird.f32 %v1514_v29 }
 0x1e9   : > { %v677_v44 = vmul.f32 %v1095_v40, %v1509_v24  ;;  %v639_v45 = vsel %vm638_vm8, %v1091_v18, %v635_v38  ;;  %v562_v46 = vpop.xlane.xlu2 %561  ;;  %v1536_v57 = vpop.eup %1096  ;;  %vm682_vm12 = vweird.f32 %v1095_v40  ;;  %vm713_vm15 = vmor %vm711_vm13, %vm712_vm11  ;;  %v748_v31 = vor.u32 1.1754944e-38, %v747_v27 }
 0x1ea   : > { %v708_v48 = vsub.f32 1.0, %v707_v41  ;;  %v644_v50 = vsel %vm641_vm10, %v643_v42, %v639_v45  ;;  %1098 = vrcp.f32 %v562_v46  ;;  %v619_v51 = vpop.f32.mrf.mxu1  ;;  %v737_v1 = vmul.f32 %v1536_v57, %v1514_v29  ;;  %vm683_vm1 = vmor %vm681_vm14, %vm682_vm12 }
 0x1eb   : > { %v678_v54 = vsub.f32 1.0, %v677_v44  ;;  %v751_v55 = vmul.f32 %v644_v50, %v607_v49  ;;  %v755_v62 = vmul.f32 %v704_v60, %v619_v51  ;;  %v732_v16 = vand.u32 2147483648, %v562_v46 }
 0x1ec   : > { %v709_v58 = vmul.f32 %v1093_v37, %v708_v48  ;;  %v738_v12 = vsub.f32 1.0, %v737_v1  ;;  %v730_v18 = vand.u32 2147483647, %v562_v46  ;;  %vm726_vm5 = vweird.f32 %v562_v46 }
 0x1ed   : > { %759 = vst.msk [vmem:[%s1501_s30] sm:$0xff] %vm359_vm0, %v751_v55  ;;  %v679_v61 = vmul.f32 %v1095_v40, %v678_v54  ;;  %v733_v21 = vor.u32 1.1754944e-38, %v732_v16  ;;  %vm742_vm8 = vweird.f32 %v1536_v57  ;;  %vm746_vm11 = vcmp.eq.f32.partialorder %v745_v28, 8.507059e+37 }
 0x1ee   : > { %v710_v0 = vadd.f32 %v1093_v37, %v709_v58  ;;  %763 = vst.msk [vmem:[%s1501_s30 + $0x20] sm:$0xff] %vm359_vm0, %v755_v62  ;;  %v739_v19 = vmul.f32 %v1536_v57, %v738_v12  ;;  %vm731_vm7 = vcmp.eq.f32.partialorder %v730_v18, 8.507059e+37  ;;  %vm743_vm10 = vmor %vm741_vm9, %vm742_vm8 }
 0x1ef   : > { %v680_v2 = vadd.f32 %v1095_v40, %v679_v61 }
 0x1f0   : > { %v1099_v3 = vpop.eup %1098  ;;  %v714_v5 = vsel %vm713_vm15, %v1093_v37, %v710_v0 }
 0x1f1   : > { %v684_v7 = vsel %vm683_vm1, %v1095_v40, %v680_v2  ;;  %v722_v8 = vmul.f32 %v1099_v3, %v562_v46  ;;  %v719_v11 = vsel %vm716_vm3, %v718_v6, %v714_v5  ;;  %vm727_vm4 = vweird.f32 %v1099_v3 }
 0x1f2   : > { %v689_v9 = vsel %vm686_vm2, %v688_v4, %v684_v7  ;;  %v622_v10 = vpop.f32.mrf.mxu1  ;;  %vm728_vm6 = vmor %vm726_vm5, %vm727_vm4 }
 0x1f3   : > { %v754_v13 = vmul.f32 %v689_v9, %v1512_v26  ;;  %v723_v14 = vsub.f32 1.0, %v722_v8  ;;  %v756_v15 = vmul.f32 %v719_v11, %v622_v10  ;;  %v740_v26 = vadd.f32 %v1536_v57, %v739_v19 }
 0x1f5   : > { %762 = vst.msk [vmem:[%s1501_s30 + $0x18] sm:$0xff] %vm359_vm0, %v754_v13  ;;  %v724_v17 = vmul.f32 %v1099_v3, %v723_v14  ;;  %v744_v30 = vsel %vm743_vm10, %v1536_v57, %v740_v26 }
 0x1f6   : > { %764 = vst.msk [vmem:[%s1501_s30 + $0x28] sm:$0xff] %vm359_vm0, %v756_v15  ;;  %v749_v33 = vsel %vm746_vm11, %v748_v31, %v744_v30 }
 0x1f7   : > { %v725_v20 = vadd.f32 %v1099_v3, %v724_v17 }
 0x1f9   : > { %v729_v22 = vsel %vm728_vm6, %v1099_v3, %v725_v20 }
 0x1fa   : > { %v625_v23 = vpop.f32.mrf.mxu1  ;;  %v734_v24 = vsel %vm731_vm7, %v733_v21, %v729_v22 }
 0x1fb   : > { %v757_v25 = vmul.f32 %v734_v24, %v625_v23 }
 0x1fd   : > { %765 = vst.msk [vmem:[%s1501_s30 + $0x30] sm:$0xff] %vm359_vm0, %v757_v25 }
 0x202   : > { %v628_v32 = vpop.f32.mrf.mxu1 }
 0x203   : > { %v758_v34 = vmul.f32 %v749_v33, %v628_v32 }
 0x205   : > { %766 = vst.msk [vmem:[%s1501_s30 + $0x38] sm:$0xff] %vm359_vm0, %v758_v34 }
 0x206   : > { %1127 = shalt.err (!%p1124_p7)
}
 0x207   : > { %s1196_s14 = smov 128   ;;  %s1197_s30 = smov 8  }
 0x208   : > { %995 = dma.vmem_to_hbm [thread:$0]  (%p1279_p3), %s783_s15, 1024, %s785_s26, %s768_s16, %s1196_s14, %s1196_s14, %s1197_s30  }
 0x209 PF: > { %p1001_p9 = scmp.ge.s32.totalorder %s1194_s25, 2  ;;  %s799_s13 = sand.u32 1, %s1166_s18  }
 0x20a   : > { %s800_s12 = scalar_lea.sflag [#allocation3], %s799_s13 }
 0x20b   : > { %p998_p10 = pnand %p1001_p9, %p1288_p8 }
 0x20d   : > { %p999_p11 = pneg %p998_p10 }
 0x20f   : > { %1161 = dma.done.wait (%p999_p11), %s800_s12, 1024  }
 0x210   : > { %1163 = vsyncadd (%p999_p11), %s800_s12, 4294966272  ;;  %s18_s25 = sadd.s32 1, %s1194_s25   ;;  %s1624_s18 = smov %s1170_s19 }
 0x211   : > { %p15_p12 = scmp.ge.s32.totalorder %s18_s25, 10   ;;  %s1625_s19 = smov %s1174_s20 }
 0x212   : > { %s1626_s20 = smov %s1297_s11  ;;  %s1627_s21 = smov %s1186_s23 }
 0x213   : > { %s1628_s22 = smov %s1190_s24  ;;  %s1629_s23 = smov %s1632_s28 }
 0x214   : > { %s1630_s24 = smov %s1636_s29  ;;  %17 = sbr.rel (!%p15_p12) target bundleno = 5 (0x5), region = 81 }
 0x219   :  { %806 = vsyncpa [#allocation3], 1 }
 0x21a   :  { %808 = vsyncpa [#allocation3 + $0x1], 1 }

</bundles_post_ra>
